<compile_context>
chip_gen: v7x
topology: tpu7x:2x2x1
jax: 0.10.0
libtpu: 0.0.40
codegen_flags: <defaults>
</compile_context>

<pallas_src>
import functools

import jax
import jax.numpy as jnp
from jax.experimental import pallas as pl
from jax.experimental.pallas import tpu as pltpu


def _round_up(x, m):
    return (x + m - 1) // m * m


def _prod_fwd_kernel(cids_ref, nm_ref, em_ref, out_ref, acc_ref, *,
                     n_chs, tile_n, tile_k, num_valid_rows):
    """One grid step: (node-row tile i) x (batch tile j) x (Nm reduction tile k).

    cids_ref: VMEM int32 [tile_n, n_chs]   child row indices, shifted by +1 row
    nm_ref:   VMEM f32   [tile_k, tile_b]  node_mars tile (reduction axis k)
    em_ref:   VMEM f32   [tile_n, tile_b]  original element_mars tile (aliased)
    out_ref:  VMEM f32   [tile_n, tile_b]  output tile (aliased with em input)
    acc_ref:  VMEM f32   [tile_n, tile_b]  accumulator scratch
    """
    i = pl.program_id(0)
    k = pl.program_id(2)

    @pl.when(k == 0)
    def _init():
        acc_ref[...] = jnp.zeros_like(acc_ref)

    # --- build the one-hot/count selection matrix S: [tile_n, tile_k] --------
    # S[n, m] = number of children c with cids[n, c] == (k * tile_k + m)
    cids_blk = cids_ref[...]                                    # [tile_n, n_chs]
    col_ids = (jax.lax.broadcasted_iota(jnp.int32, (tile_n, tile_k), 1)
               + k * tile_k)                                    # global Nm row ids
    s = jnp.zeros((tile_n, tile_k), dtype=jnp.float32)
    for c in range(n_chs):                                      # n_chs is small; static unroll
        s = s + (cids_blk[:, c:c + 1] == col_ids).astype(jnp.float32)

    # --- MXU: gather + sum over children == S @ node_mars_tile ---------------
    # TODO(synk): optionally feed the MXU in bf16 (S is exact in bf16) when the
    # caller tolerates reduced precision on node_mars values.
    acc_ref[...] += jnp.dot(s, nm_ref[...], preferred_element_type=jnp.float32)

    # --- last reduction step: merge with original element_mars and write -----
    @pl.when(k == pl.num_programs(2) - 1)
    def _finalize():
        row_ids = (jax.lax.broadcasted_iota(jnp.int32, acc_ref.shape, 0)
                   + i * tile_n)
        valid = (row_ids >= 1) & (row_ids < num_valid_rows)
        out_ref[...] = jnp.where(valid, acc_ref[...], em_ref[...]).astype(out_ref.dtype)


def prod_layer_forward(node_mars, element_mars, cids, *,
                       tile_nodes=256, tile_k=256, tile_batch=512):
    """Functional equivalent of ProdLayer._dense_forward_pass.

    node_mars:    f32 [Nm, B]
    element_mars: f32 [Ne, B]   (Ne >= num_nodes + 1)
    cids:         int [num_nodes, max_n_chs]
    Returns the updated element_mars (rows 0 and > num_nodes preserved).
    """
    num_nodes, n_chs = cids.shape
    nm_rows, batch = node_mars.shape
    ne_rows, batch_e = element_mars.shape
    assert batch_e == batch
    assert ne_rows >= num_nodes + 1

    # --- tile sizes (respect the (8, 128) layout constraints) -----------------
    tn = _round_up(min(tile_nodes, _round_up(num_nodes + 1, 8)), 8)
    tk = _round_up(min(tile_k, _round_up(nm_rows, 8)), 8)
    pb = _round_up(batch, 128)
    tb = min(_round_up(tile_batch, 128), pb)
    while pb % tb != 0:           # tb stays a multiple of 128; terminates at 128
        tb -= 128

    rows_written = _round_up(num_nodes + 1, tn)      # element rows touched by the grid
    pe = max(_round_up(ne_rows, tn), rows_written)   # padded element rows
    pk = _round_up(nm_rows, tk)                      # padded node_mars rows

    num_i, num_j, num_k = rows_written // tn, pb // tb, pk // tk

    # --- pad operands only when not tile-aligned (no-op copies when aligned) --
    nm_p = node_mars
    if (pk, pb) != (nm_rows, batch):
        nm_p = jnp.zeros((pk, pb), node_mars.dtype).at[:nm_rows, :batch].set(node_mars)
    em_p = element_mars
    if (pe, pb) != (ne_rows, batch):
        em_p = jnp.zeros((pe, pb), element_mars.dtype).at[:ne_rows, :batch].set(element_mars)

    # cids shifted by +1 so row r of cids_p corresponds to element_mars row r.
    cids_p = jnp.zeros((rows_written, n_chs), dtype=jnp.int32)
    cids_p = cids_p.at[1:num_nodes + 1, :].set(cids.astype(jnp.int32))

    kernel = functools.partial(
        _prod_fwd_kernel, n_chs=n_chs, tile_n=tn, tile_k=tk,
        num_valid_rows=num_nodes + 1)

    itemsize = jnp.dtype(node_mars.dtype).itemsize
    vmem_needed = (2 * tn * max(n_chs, 128) * 4      # cids blocks (lane-padded, dbl-buffered)
                   + 2 * tk * tb * itemsize          # node_mars blocks
                   + 2 * tn * tb * itemsize          # element_mars blocks
                   + 2 * tn * tb * itemsize          # output blocks
                   + tn * tb * 4                     # accumulator scratch
                   + 2 * tn * tk * 4)                # selection-matrix temporaries
    vmem_limit = int(min(64 * 1024 * 1024, max(2 * vmem_needed, 32 * 1024 * 1024)))

    out = pl.pallas_call(
        kernel,
        out_shape=jax.ShapeDtypeStruct((pe, pb), element_mars.dtype),
        grid_spec=pltpu.PrefetchScalarGridSpec(
            num_scalar_prefetch=0,
            grid=(num_i, num_j, num_k),
            in_specs=[
                pl.BlockSpec((tn, n_chs), lambda i, j, k: (i, 0)),   # cids tile
                pl.BlockSpec((tk, tb), lambda i, j, k: (k, j)),      # node_mars tile
                pl.BlockSpec((tn, tb), lambda i, j, k: (i, j)),      # element_mars tile
            ],
            out_specs=pl.BlockSpec((tn, tb), lambda i, j, k: (i, j)),
            scratch_shapes=[pltpu.VMEM((tn, tb), jnp.float32)],
        ),
        input_output_aliases={2: 0},     # write directly into element_mars
        compiler_params=pltpu.CompilerParams(
            dimension_semantics=("parallel", "parallel", "arbitrary"),
            vmem_limit_bytes=vmem_limit,
        ),
    )(cids_p, nm_p, em_p)

    if (pe, pb) != (ne_rows, batch):
        out = out[:ne_rows, :batch]
    return out


# TODO(synk): backward pass (node_flows[u_cids] += element_flows[parids].sum(1))
# and the skip_logsumexp (prod) variant follow the same selection-matmul
# pattern (scatter-add / log-domain product) and are not implemented here.


if __name__ == "__main__":
    key = jax.random.PRNGKey(0)
    k1, k2, k3 = jax.random.split(key, 3)

    # Small synthetic ProdLayer configuration (stand-in for the region graph):
    num_nodes = 30       # layer_num_nodes
    max_n_chs = 3        # max number of children per partition node
    nm_rows = 24         # rows of node_mars (children layer outputs, row 0 = pad)
    batch = 256          # batch size B
    ne_rows = 32         # max_num_els (>= num_nodes + 1)

    node_mars = jax.random.normal(k1, (nm_rows, batch), dtype=jnp.float32)
    cids = jax.random.randint(k2, (num_nodes, max_n_chs), 0, nm_rows, dtype=jnp.int32)
    # Non-zero element_mars so the preserve-rows-outside-[1, num_nodes] path is tested.
    element_mars = jax.random.normal(k3, (ne_rows, batch), dtype=jnp.float32)

    # Reference (pure JAX) forward semantics.
    ref = element_mars.at[1:num_nodes + 1, :].set(node_mars[cids].sum(axis=1))

    # Small tiles: exercises a multi-step grid (2 node tiles x 2 batch tiles x 3 k tiles),
    # i.e. the pl.when init/finalize accumulator path.
    out_small = prod_layer_forward(node_mars, element_mars, cids,
                                   tile_nodes=16, tile_k=8, tile_batch=128)
    out_small = jax.block_until_ready(out_small)
    assert jnp.allclose(out_small, ref, atol=1e-4, rtol=1e-4)

    # Default (production-sized) tiles: clamps to the small shapes, single grid step.
    out_default = prod_layer_forward(node_mars, element_mars, cids)
    out_default = jax.block_until_ready(out_default)
    assert jnp.allclose(out_default, ref, atol=1e-4, rtol=1e-4)

    print("KERNEL_OK")
</pallas_src>

<mosaic_0001>
module attributes {stable_mosaic.version = 11 : i64} {
  func.func @_prod_fwd_kernel(%arg0: i32, %arg1: i32, %arg2: i32, %arg3: memref<16x3xi32, #tpu.memory_space<vmem>>, %arg4: memref<8x128xf32, #tpu.memory_space<vmem>>, %arg5: memref<16x128xf32, #tpu.memory_space<vmem>>, %arg6: memref<16x128xf32, #tpu.memory_space<vmem>>, %arg7: memref<16x128xf32, #tpu.memory_space<vmem>>) attributes {dimension_semantics = [#tpu.dimension_semantics<parallel>, #tpu.dimension_semantics<parallel>, #tpu.dimension_semantics<arbitrary>], iteration_bounds = array<i64: 2, 2, 3>, scalar_prefetch = 0 : i64, scratch_operands = 1 : i64, tpu.core_type = #tpu.core_type<tc>, window_params = [{transform_indices = @transform_0, window_bounds = array<i64: 16, 3>}, {transform_indices = @transform_1, window_bounds = array<i64: 8, 128>}, {transform_indices = @transform_2, window_bounds = array<i64: 16, 128>}, {transform_indices = @transform_3, window_bounds = array<i64: 16, 128>}]} {
    %c0_i32 = arith.constant 0 : i32
    %0 = arith.cmpi eq, %arg2, %c0_i32 : i32
    %1 = arith.extui %0 : i1 to i32
    %c0_i32_0 = arith.constant 0 : i32
    %2 = arith.cmpi ne, %1, %c0_i32_0 : i32
    scf.if %2 {
      %cst_10 = arith.constant 0.000000e+00 : f32
      %35 = vector.broadcast %cst_10 : f32 to vector<16x128xf32>
      %c0_11 = arith.constant 0 : index
      %c0_12 = arith.constant 0 : index
      %36 = vector.load %arg7[%c0_11, %c0_12] : memref<16x128xf32, #tpu.memory_space<vmem>>, vector<16x128xf32>
      tpu.vector_store %arg7[%c0_11, %c0_12], %35 {strides = array<i32>} : memref<16x128xf32, #tpu.memory_space<vmem>>, vector<16x128xf32>,
    } else {
    }
    %c0 = arith.constant 0 : index
    %c0_1 = arith.constant 0 : index
    %3 = vector.load %arg3[%c0, %c0_1] : memref<16x3xi32, #tpu.memory_space<vmem>>, vector<16x3xi32>
    %4 = tpu.iota {dimensions = array<i32: 1>} : vector<16x8xi32>
    %c8_i32 = arith.constant 8 : i32
    %5 = arith.muli %arg2, %c8_i32 : i32
    %6 = vector.broadcast %5 : i32 to vector<16x8xi32>
    %7 = arith.addi %4, %6 : vector<16x8xi32>
    %cst = arith.constant 0.000000e+00 : f32
    %8 = vector.broadcast %cst : f32 to vector<16x8xf32>
    %9 = vector.extract_strided_slice %3 {offsets = [0, 0], sizes = [16, 1], strides = [1, 1]} : vector<16x3xi32> to vector<16x1xi32>
    %10 = vector.broadcast %9 : vector<16x1xi32> to vector<16x8xi32>
    %11 = arith.cmpi eq, %10, %7 : vector<16x8xi32>
    %12 = arith.extui %11 : vector<16x8xi1> to vector<16x8xi32>
    %13 = arith.sitofp %12 : vector<16x8xi32> to vector<16x8xf32>
    %14 = arith.addf %8, %13 : vector<16x8xf32>
    %15 = vector.extract_strided_slice %3 {offsets = [0, 1], sizes = [16, 1], strides = [1, 1]} : vector<16x3xi32> to vector<16x1xi32>
    %16 = vector.broadcast %15 : vector<16x1xi32> to vector<16x8xi32>
    %17 = arith.cmpi eq, %16, %7 : vector<16x8xi32>
    %18 = arith.extui %17 : vector<16x8xi1> to vector<16x8xi32>
    %19 = arith.sitofp %18 : vector<16x8xi32> to vector<16x8xf32>
    %20 = arith.addf %14, %19 : vector<16x8xf32>
    %21 = vector.extract_strided_slice %3 {offsets = [0, 2], sizes = [16, 1], strides = [1, 1]} : vector<16x3xi32> to vector<16x1xi32>
    %22 = vector.broadcast %21 : vector<16x1xi32> to vector<16x8xi32>
    %23 = arith.cmpi eq, %22, %7 : vector<16x8xi32>
    %24 = arith.extui %23 : vector<16x8xi1> to vector<16x8xi32>
    %25 = arith.sitofp %24 : vector<16x8xi32> to vector<16x8xf32>
    %26 = arith.addf %20, %25 : vector<16x8xf32>
    %c0_2 = arith.constant 0 : index
    %c0_3 = arith.constant 0 : index
    %27 = vector.load %arg7[%c0_2, %c0_3] : memref<16x128xf32, #tpu.memory_space<vmem>>, vector<16x128xf32>
    %c0_4 = arith.constant 0 : index
    %c0_5 = arith.constant 0 : index
    %28 = vector.load %arg4[%c0_4, %c0_5] : memref<8x128xf32, #tpu.memory_space<vmem>>, vector<8x128xf32>
    %cst_6 = arith.constant dense<0.000000e+00> : vector<16x128xf32>
    %29 = tpu.matmul %26, %28, %cst_6 {dimension_numbers = #tpu.dot_dimension_numbers<[1], [0], [0], [1], [0, 0, 1, 1], [], []>} : vector<16x8xf32>, vector<8x128xf32>, vector<16x128xf32> -> vector<16x128xf32>
    %30 = arith.addf %27, %29 : vector<16x128xf32>
    %c0_7 = arith.constant 0 : index
    %c0_8 = arith.constant 0 : index
    %31 = vector.load %arg7[%c0_7, %c0_8] : memref<16x128xf32, #tpu.memory_space<vmem>>, vector<16x128xf32>
    tpu.vector_store %arg7[%c0_7, %c0_8], %30 {strides = array<i32>} : memref<16x128xf32, #tpu.memory_space<vmem>>, vector<16x128xf32>,
    %c2_i32 = arith.constant 2 : i32
    %32 = arith.cmpi eq, %arg2, %c2_i32 : i32
    %33 = arith.extui %32 : i1 to i32
    %c0_i32_9 = arith.constant 0 : i32
    %34 = arith.cmpi ne, %33, %c0_i32_9 : i32
    scf.if %34 {
      %35 = tpu.iota {dimensions = array<i32: 0>} : vector<16x128xi32>
      %c16_i32 = arith.constant 16 : i32
      %36 = arith.muli %arg0, %c16_i32 : i32
      %37 = vector.broadcast %36 : i32 to vector<16x128xi32>
      %38 = arith.addi %35, %37 : vector<16x128xi32>
      %c1_i32 = arith.constant 1 : i32
      %39 = vector.broadcast %c1_i32 : i32 to vector<16x128xi32>
      %40 = arith.cmpi sge, %38, %39 : vector<16x128xi32>
      %c31_i32 = arith.constant 31 : i32
      %41 = vector.broadcast %c31_i32 : i32 to vector<16x128xi32>
      %42 = arith.cmpi slt, %38, %41 : vector<16x128xi32>
      %43 = arith.andi %40, %42 : vector<16x128xi1>
      %c0_10 = arith.constant 0 : index
      %c0_11 = arith.constant 0 : index
      %44 = vector.load %arg7[%c0_10, %c0_11] : memref<16x128xf32, #tpu.memory_space<vmem>>, vector<16x128xf32>
      %c0_12 = arith.constant 0 : index
      %c0_13 = arith.constant 0 : index
      %45 = vector.load %arg5[%c0_12, %c0_13] : memref<16x128xf32, #tpu.memory_space<vmem>>, vector<16x128xf32>
      %46 = arith.select %43, %44, %45 : vector<16x128xi1>, vector<16x128xf32>
      %c0_14 = arith.constant 0 : index
      %c0_15 = arith.constant 0 : index
      %47 = vector.load %arg6[%c0_14, %c0_15] : memref<16x128xf32, #tpu.memory_space<vmem>>, vector<16x128xf32>
      tpu.vector_store %arg6[%c0_14, %c0_15], %46 {strides = array<i32>} : memref<16x128xf32, #tpu.memory_space<vmem>>, vector<16x128xf32>,
    } else {
    }
    return
  }
  func.func @transform_0(%arg0: i32, %arg1: i32, %arg2: i32) -> (i32, i32) {
    %c0_i32 = arith.constant 0 : i32
    %c0_i32_0 = arith.constant 0 : i32
    return %arg0, %c0_i32 : i32, i32
  }
  func.func @transform_1(%arg0: i32, %arg1: i32, %arg2: i32) -> (i32, i32) {
    %c0_i32 = arith.constant 0 : i32
    return %arg2, %arg1 : i32, i32
  }
  func.func @transform_2(%arg0: i32, %arg1: i32, %arg2: i32) -> (i32, i32) {
    %c0_i32 = arith.constant 0 : i32
    return %arg0, %arg1 : i32, i32
  }
  func.func @transform_3(%arg0: i32, %arg1: i32, %arg2: i32) -> (i32, i32) {
    %c0_i32 = arith.constant 0 : i32
    return %arg0, %arg1 : i32, i32
  }
}

</mosaic_0001>

<bundles_post_ra>
// kernel: tpu_custom_call.1
= control target key start
LH: loop header
LB: loop body
LE: loop exit
PB: predicated region body
PF: predicated region fallthrough
CT: control target
= control target key end

     0   :  { %s1164_s0 = inlined_call_operand.vmem [shape: s32[32,3], index: 0, kind: input, shape index: {}]   ;;  %s1165_s1 = inlined_call_operand.vmem [shape: f32[24,256], index: 1, kind: input, shape index: {}]   ;;  %s1166_s2 = inlined_call_operand.hbm [shape: f32[32,256], index: 2, kind: input, shape index: {}, may-alias: {2,3}]   ;;  %s1167_s3 = inlined_call_operand.hbm [shape: f32[32,256], index: 3, kind: output, shape index: {}, may-alias: {2,3}]  }
   0x1   :  { %1173 = sst [smem:[#allocation13_spill]] %s1166_s2 }
   0x2   :  { %1174 = sst [smem:[#allocation14_spill]] %s1167_s3 }
   0x3   :  { %8 = vsyncpa [#allocation4], 0 }
   0x4   :  { %10 = vsyncpa [#allocation4 + $0x1], 0 }
   0x5   :  { %11 = vsyncpa [#allocation5], 0 }
   0x6   :  { %13 = vsyncpa [#allocation5 + $0x1], 0  ;;  %s911_s12 = smov 0   ;;  %s913_s13 = smov 0  }
   0x7   :  { %s915_s14 = smov 0   ;;  %s917_s15 = smov 0  }
   0x8   :  { %s919_s16 = smov 0   ;;  %s921_s17 = smov 0  }
   0x9   :  { %s923_s18 = smov 0   ;;  %s925_s19 = smov 0  }
   0xa   :  { %s927_s20 = smov 0   ;;  %s929_s21 = smov 0  }
   0xb LB: > { %1175 = sst [smem:[#allocation9_spill]] %s840_s12  ;;  %s578_s22 = sadd.s32 4294967295, %s876_s21   ;;  %s876_s21 = sphi %s929_s21, %s19_s21   ;;  %s872_s20 = sphi %s927_s20, %s1198_s20   ;;  %s868_s19 = sphi %s925_s19, %s1197_s19   ;;  %s864_s18 = sphi %s923_s18, %s1190_s18   ;;  %s860_s17 = sphi %s921_s17, %s1196_s17   ;;  %s856_s16 = sphi %s919_s16, %s1195_s16   ;;  %s852_s15 = sphi %s917_s15, %s1189_s15   ;;  %s848_s14 = sphi %s915_s14, %s1194_s14   ;;  %s844_s13 = sphi %s913_s13, %s1193_s13   ;;  %s840_s12 = sphi %s911_s12, %s1192_s12  }
   0xc   : > { %1176 = sst [smem:[#allocation10_spill]] %s864_s18  ;;  %s579_s23 = sadd.s32 4294967294, %s876_s21  }
   0xd   : > { %s31_s24 = sadd.s32 1, %s864_s18  ;;  %s34_s25 = sadd.s32 1, %s868_s19 }
   0xe   : > { %p32_p0 = scmp.ge.s32.totalorder %s31_s24, 3  ;;  %s38_s26 = sadd.s32 1, %s872_s20 }
   0xf   : > { %s101_s27 = sadd.s32 1, %s848_s14  ;;  %p108_p1 = scmp.ne.s32.totalorder %s848_s14, %s844_s13 }
  0x10   : > { %s1200_s24 = smov (%p32_p0, %s31_s24), 0  ;;  %s1202_s25 = smov (!%p32_p0, %s34_s25), %s868_s19 }
  0x11   : > { %1177 = sst [smem:[#allocation11_spill]] %s1200_s24  ;;  %p109_p2 = scmp.eq.s32.totalorder %s876_s21, 0 }
  0x12   : > { %p114_p3 = scmp.ne.s32.totalorder %s844_s13, %s840_s12  ;;  %p36_p4 = scmp.ge.s32.totalorder %s1202_s25, 2 }
  0x13   : > { %p115_p5 = scmp.eq.s32.totalorder %s578_s22, 0  ;;  %p978_p6 = por %p109_p2, %p108_p1 }
  0x14   : > { %p140_p7 = scmp.eq.s32.totalorder %s578_s22, 11  ;;  %s1204_s25 = smov (%p36_p4, %s1202_s25), 0 }
  0x15   : > { %1179 = sst [smem:[#allocation12_spill]] %s1204_s25  ;;  %s1206_s26 = smov (!%p36_p4, %s38_s26), %s872_s20 }
  0x16   : > { %s97_s29 = ssub.s32 %s868_s19, %s1204_s25  ;;  %p990_p8 = por %p115_p5, %p114_p3 }
  0x17   : > { %p40_p9 = scmp.ge.s32.totalorder %s1206_s26, 2  ;;  %p997_p10 = por %p140_p7, %p108_p1 }
  0x18   : > { %p146_p11 = scmp.eq.s32.totalorder %s579_s23, 11  ;;  %p633_p13 = scmp.lt.s32.totalorder %s876_s21, 12 }
  0x19   : > { %s1181_s4 = scalar_select %p997_p10, 1, 0 }
  0x1a   : > { %s1208_s26 = smov (%p40_p9, %s1206_s26), 0  ;;  %p1006_p12 = por %p146_p11, %p114_p3 }
  0x1b   : > { %s96_s6 = ssub.s32 %s872_s20, %s1208_s26  ;;  %s186_s7 = sand.u32 1, %s848_s14  }
  0x1c   : > { %s1182_s5 = scalar_select %p1006_p12, 1, 0 }
  0x1d   : > { %s98_s8 = sor.u32 %s97_s29, %s96_s6  ;;  %s582_s9 = sshll.u32 %s186_s7, 4 }
  0x1e   : > { %p99_p0 = scmp.eq.s32.totalorder %s98_s8, 0  ;;  %s611_s10 = sshll.u32 %s872_s20, 2 }
  0x1f   : > { %s196_s22 = sadd.s32 %s868_s19, %s611_s10  ;;  %s190_s23 = scalar_lea.vmem [#allocation3], %s582_s9 }
  0x20   : > { %s1016_s11 = scalar_select %p99_p0, %s848_s14, %s101_s27  }
  0x21   : > { %s199_s25 = sshll.u32 %s190_s23, 4  ;;  %s585_s24 = sshll.u32 %s196_s22, 7  ;;  %s1019_s25 = int_to_ptr.vmem [resolvable:$true] %s199_s25 }
  0x22   : > { %s1183_s2 = sld [smem:[#allocation13_spill]]  ;;  %p1030_p1 = pnand %p633_p13, %p978_p6 }
  0x23   : > { %s1034_s29 = scalar_lea.sflag [#allocation4], %s186_s7 }
  0x24   : > { %p734_p3 = pneg %p1030_p1 }
  0x28   : > { %s1024_s3 = scalar_lea.hbm %s1183_s2, %s585_s24  ;;  %s737_s24 = scalar_lea.hbm %s1183_s2, 1024 }
  0x29   : > { %s732_s6 = scalar_lea.hbm %s1024_s3, 256  ;;  %p738_p6 = scmp.lt.u32.totalorder %s1024_s3, %s1183_s2 }
  0x2a   : > { %p733_p2 = scmp.ne.s32.totalorder %s1024_s3, %s732_s6  ;;  %p739_p7 = scmp.lt.u32.totalorder %s737_s24, %s732_s6 }
  0x2b   : > { %p741_p11 = scmp.lt.u32.totalorder %s732_s6, %s1024_s3 }
  0x2c   : > { %p735_p4 = pnand %p734_p3, %p733_p2  ;;  %p740_p9 = por %p739_p7, %p738_p6 }
  0x2e   : > { %p736_p5 = pneg %p735_p4  ;;  %p742_p13 = por %p741_p11, %p740_p9 }
  0x30   : > { %p743_p0 = pnand %p742_p13, %p736_p5 }
  0x32   : > { %746 = shalt.err (!%p743_p0)
}
  0x33   : > { %s747_s7 = scalar_lea.vmem %s1019_s25, 256  ;;  %s878_s9 = smov [#allocation3]  }
  0x34   : > { %p748_p2 = scmp.ne.s32.totalorder %s1019_s25, %s747_s7  ;;  %s752_s10 = sshll.u32 %s878_s9, 4  ;;  %s753_s10 = int_to_ptr.vmem [resolvable:$false] %s752_s10 }
  0x35   : > { %s754_s22 = scalar_lea.vmem %s753_s10, 512  ;;  %p755_p10 = scmp.lt.s32.totalorder %s1019_s25, %s753_s10 }
  0x36   : > { %p750_p4 = pnand %p748_p2, %p734_p3  ;;  %p756_p6 = scmp.lt.s32.totalorder %s754_s22, %s747_s7 }
  0x38   : > { %p751_p12 = pneg %p750_p4  ;;  %p757_p7 = por %p756_p6, %p755_p10 }
  0x3a   : > { %p758_p9 = pnand %p757_p7, %p751_p12 }
  0x3c   : > { %761 = shalt.err (!%p758_p9)
}
  0x3d   : > { %s879_s23 = smov 256   ;;  %s880_s6 = smov 128  }
  0x3e   : > { %s881_s12 = smov 8   ;;  %p586_p3 = scmp.ge.s32.totalorder %s876_s21, 1 }
  0x3f   : > { %628 = dma.hbm_to_vmem [thread:$0]  (!%p1030_p1), %s1024_s3, 256, %s1019_s25, %s1034_s29, %s879_s23, %s880_s6, %s881_s12  }
  0x40   : > { %p207_p5 = scmp.lt.s32.totalorder %s876_s21, 13 }
  0x42   : > { %p208_p11 = pnand %p586_p3, %p207_p5 }
  0x43   : > { %s1065_s18 = sand.u32 (!%p208_p11), 1, %s844_s13  }
  0x44   : > { %211 = sbr.rel (%p208_p11) target bundleno = 489 (0x1e9), region = 32  ;;  %s587_s24 = sshll.u32 (!%p208_p11), %s1065_s18, 4 }
  0x45   : > { %s214_s28 = scalar_lea.sflag (!%p208_p11), [#allocation4], %s1065_s18  ;;  %s1069_s8 = scalar_lea.vmem (!%p208_p11), [#allocation3], %s587_s24 }
  0x4b   : > { %831 = dma.done.wait (%p990_p8), %s214_s28, 256  }
  0x4c   : > { %833 = vsyncadd (%p990_p8), %s214_s28, 4294967040  ;;  %s589_s3 = sshll.u32 %s860_s17, 1  ;;  %p259_p12 = scmp.lt.s32.totalorder %s852_s15, 2 }
  0x4d   : > { %p254_p10 = scmp.lt.s32.totalorder %s589_s3, 3  ;;  %p261_p1 = scmp.lt.s32.totalorder %s856_s16, 1 }
  0x4e   : > { %s260_s25 = scalar_select %p259_p12, %s852_s15, 2 }
  0x4f   : > { %s1210_s3 = smov (!%p254_p10, %s589_s3), 3  ;;  %s1086_s2 = scalar_lea.vmem [#allocation6], %s587_s24 }
  0x50   : > { %s590_s27 = sshll.u32 %s1210_s3, 3  ;;  %s591_s10 = sshll.u32 %s260_s25, 1 }
  0x51   : > { %s257_s9 = scalar_lea.vmem %s1164_s0, %s590_s27  ;;  %p593_p8 = scmp.ne.s32.totalorder %s852_s15, 0 }
  0x52   : > { %s262_s22 = scalar_select %p261_p1, %s856_s16, 1 }
  0x53   : > { %272 = sbr.rel (%p593_p8) target bundleno = 90 (0x5a), region = 40  ;;  %v882_v0 = vmov (!%p593_p8), 0.0  }
  0x54   : > { %s264_s30 = sadd.s32 %s591_s10, %s262_s22  ;;  %273 = vst [vmem:[#allocation2] sm:$0xff] (!%p593_p8), %v882_v0  ;;  %274 = vst [vmem:[#allocation2 + $0x8] sm:$0xff] (!%p593_p8), %v882_v0 }
  0x55   : > { %s592_s23 = sshll.u32 %s264_s30, 3 }
  0x56   : > { %s266_s28 = scalar_lea.vmem %s1165_s1, %s592_s23 }
  0x5a PF: > { %v276_v1 = vld [vmem:[%s257_s9 + $0x8] sm:$0xff]  ;;  %v275_v2 = vld [vmem:[%s257_s9] sm:$0xff]  ;;  %v883_v3 = vmov 0   ;;  %v884_v4 = vmov 1   ;;  %v885_v5 = vmov 2   ;;  %v277_v7 = vlaneseq  ;;  %s594_s24 = sshll.u32 %s852_s15, 3 }
  0x5b   : > { %728 = vset.pattern.permute.xlu1 %v883_v3  ;;  %726 = vset.pattern.permute.xlu0 %v883_v3  ;;  %v326_v6 = vld [vmem:[%s266_s28] sm:$0xff]  ;;  %v280_v9 = vstv %s594_s24  ;;  %v886_v15 = vmov 0.0   ;;  %vm327_vm6 = vcmask 64512   ;;  %v325_v28 = vld [vmem:[#allocation2 + $0x8] sm:$0xff]  ;;  %p603_p13 = scmp.ne.s32.totalorder %s852_s15, 2 }
  0x5c   : > { %286 = vperm.xlu1 %728, %v276_v1   ;;  %283 = vperm.xlu0 %726, %v275_v2   ;;  %v278_v8 = vand.u32 127, %v277_v7  ;;  %v324_v29 = vld [vmem:[#allocation2] sm:$0xff]  ;;  %v418_v34 = vshrl.u32 (!%p603_p13), %v277_v7, 7  ;;  %s604_s3 = sshll.u32 (!%p603_p13), %s860_s17, 4  ;;  %v433_v42 = vld [vmem:[%s1069_s8 + $0x8] sm:$0xff] (!%p603_p13) }
  0x5d   : > { %616 = vmatprep.subr.mxu0 %v326_v6  ;;  %v421_v35 = vstv (!%p603_p13), %s604_s3  ;;  %v432_v39 = vld [vmem:[%s1069_s8] sm:$0xff] (!%p603_p13) }
  0x5e   : > { %617 = vmatpush3.msra.mxu0 %v326_v6  ;;  %v281_v12 = vadd.s32 %v280_v9, %v278_v8  ;;  %v422_v36 = vadd.s32 (!%p603_p13), %v421_v35, %v418_v34  ;;  %v419_v37 = vadd.s32 (!%p603_p13), 8, %v418_v34 }
  0x60   : > { %729 = vset.pattern.permute.xlu1 %v884_v4  ;;  %727 = vset.pattern.permute.xlu0 %v884_v4  ;;  %vm424_vm7 = vcmp.ge.s32.totalorder (!%p603_p13), %v422_v36, 1  ;;  %vm426_vm8 = vcmp.lt.s32.totalorder (!%p603_p13), %v422_v36, 31  ;;  %v423_v40 = vadd.s32 (!%p603_p13), %v421_v35, %v419_v37 }
  0x61   : > { %300 = vperm.xlu1 %729, %v276_v1   ;;  %297 = vperm.xlu0 %727, %v275_v2   ;;  %vm428_vm9 = vmand (!%p603_p13), %vm424_vm7, %vm426_vm8 }
  0x62   : > { %vm425_vm10 = vcmp.ge.s32.totalorder (!%p603_p13), %v423_v40, 1  ;;  %vm427_vm11 = vcmp.lt.s32.totalorder (!%p603_p13), %v423_v40, 31 }
  0x63   : > { %vm429_vm12 = vmand (!%p603_p13), %vm425_vm10, %vm427_vm11 }
  0x65   : > { %730 = vset.pattern.permute.xlu1 %v885_v5  ;;  %731 = vset.pattern.permute.xlu0 %v885_v5 }
  0x66   : > { %311 = vperm.xlu1 %730, %v275_v2   ;;  %314 = vperm.xlu0 %731, %v276_v1  }
  0xdb   : > { %v287_v10 = vpop.permute.xlu1 %286  ;;  %v284_v11 = vpop.permute.xlu0 %283 }
  0xdc   : > { %vm289_vm2 = vcmp.eq.s32.totalorder %v287_v10, %v281_v12  ;;  %vm288_vm3 = vcmp.eq.s32.totalorder %v284_v11, %v281_v12 }
  0xdd   : > { %v596_v18 = vsel %vm289_vm2, 1.0, %v886_v15  ;;  %v595_v19 = vsel %vm288_vm3, 1.0, %v886_v15 }
  0xe0   : > { %v301_v13 = vpop.permute.xlu1 %300  ;;  %v298_v14 = vpop.permute.xlu0 %297 }
  0xe1   : > { %vm303_vm0 = vcmp.eq.s32.totalorder %v301_v13, %v281_v12  ;;  %vm302_vm1 = vcmp.eq.s32.totalorder %v298_v14, %v281_v12 }
  0xe2   : > { %v598_v16 = vsel %vm303_vm0, 1.0, %v886_v15  ;;  %v597_v17 = vsel %vm302_vm1, 1.0, %v886_v15 }
  0xe3   : > { %v309_v22 = vadd.f32 %v598_v16, %v596_v18  ;;  %v308_v23 = vadd.f32 %v597_v17, %v595_v19 }
  0xe5   : > { %v312_v20 = vpop.permute.xlu1 %311  ;;  %v315_v21 = vpop.permute.xlu0 %314 }
  0xe6   : > { %vm316_vm4 = vcmp.eq.s32.totalorder %v312_v20, %v281_v12  ;;  %vm317_vm5 = vcmp.eq.s32.totalorder %v315_v21, %v281_v12 }
  0xe7   : > { %v599_v24 = vsel %vm316_vm4, 1.0, %v886_v15  ;;  %v600_v25 = vsel %vm317_vm5, 1.0, %v886_v15 }
  0xe8   : > { %v323_v26 = vadd.f32 %v600_v25, %v309_v22  ;;  %v322_v27 = vadd.f32 %v599_v24, %v308_v23 }
  0xea   : > { %618 = vmatprep.mubr.msk.f32.mxu0 %vm327_vm6, %v322_v27 }
  0xeb   : > { %619 = vmatmul.mubr.msk.f32.vlgmr.msra.gmra.mrb[0].mxu0 %vm327_vm6, %v323_v26 }
 0x1bc   : > { %416 = sbr.rel (%p603_p13) target bundleno = 460 (0x1cc), region = 44 }
 0x1be   : > { %v620_v30 = vpop.f32.mrb[0].mxu0 }
 0x1bf   : > { %v410_v31 = vadd.f32 %v620_v30, %v325_v28  ;;  %v400_v32 = vpop.f32.mrb[1].mxu0 }
 0x1c0   : > { %v409_v33 = vadd.f32 %v400_v32, %v324_v29 }
 0x1c1   : > { %412 = vst [vmem:[#allocation2 + $0x8] sm:$0xff] %v410_v31 }
 0x1c2   : > { %411 = vst [vmem:[#allocation2] sm:$0xff] %v409_v33 }
 0x1c8   : > { %v431_v41 = vld [vmem:[#allocation2 + $0x8] sm:$0xff] }
 0x1c9   : > { %v430_v38 = vld [vmem:[#allocation2] sm:$0xff]  ;;  %v435_v44 = vsel %vm429_vm12, %v431_v41, %v433_v42 }
 0x1ca   : > { %v434_v43 = vsel %vm428_vm9, %v430_v38, %v432_v39  ;;  %437 = vst [vmem:[%s1086_s2 + $0x8] sm:$0xff] %v435_v44 }
 0x1cb   : > { %436 = vst [vmem:[%s1086_s2] sm:$0xff] %v434_v43 }
 0x1cc PF: > { %s612_s15 = sshll.u32 %s860_s17, 2  ;;  %s454_s27 = sshll.u32 %s1086_s2, 4  ;;  %s1099_s27 = int_to_ptr.vmem [resolvable:$true] %s454_s27 }
 0x1cd   : > { %s451_s25 = sadd.s32 %s856_s16, %s612_s15  ;;  %s1185_s9 = sld [smem:[#allocation14_spill]] }
 0x1ce   : > { %s608_s29 = sshll.u32 %s451_s25, 7  ;;  %s439_s22 = scalar_lea.sflag [#allocation5], %s1065_s18 }
 0x1cf   : > { %s762_s30 = scalar_lea.vmem %s1099_s27, 256  ;;  %p1186_p2 = scmp.ne.s32.totalorder %s1181_s4, 0 }
 0x1d0   : > { %p763_p0 = scmp.ne.s32.totalorder %s1099_s27, %s762_s30  ;;  %s887_s17 = smov [#allocation6]  }
 0x1d1   : > { %s766_s16 = sshll.u32 %s887_s17, 4  ;;  %s767_s16 = int_to_ptr.vmem [resolvable:$false] %s766_s16 }
 0x1d2   : > { %p764_p4 = pnand %p763_p0, %p1186_p2  ;;  %s768_s2 = scalar_lea.vmem %s767_s16, 512 }
 0x1d3   : > { %s1104_s10 = scalar_lea.hbm %s1185_s9, %s608_s29  ;;  %p769_p7 = scmp.lt.s32.totalorder %s1099_s27, %s767_s16 }
 0x1d4   : > { %p765_p6 = pneg %p764_p4  ;;  %p770_p9 = scmp.lt.s32.totalorder %s768_s2, %s762_s30 }
 0x1d6   : > { %p771_p3 = por %p770_p9, %p769_p7 }
 0x1d8   : > { %p772_p5 = pnand %p771_p3, %p765_p6 }
 0x1da   : > { %775 = shalt.err (!%p772_p5)
}
 0x1db   : > { %s776_s23 = scalar_lea.hbm %s1104_s10, 256  ;;  %s780_s28 = scalar_lea.hbm %s1185_s9, 1024 }
 0x1dc   : > { %p777_p11 = scmp.ne.s32.totalorder %s1104_s10, %s776_s23  ;;  %p781_p1 = scmp.lt.u32.totalorder %s1104_s10, %s1185_s9 }
 0x1dd   : > { %p782_p8 = scmp.lt.u32.totalorder %s780_s28, %s776_s23  ;;  %p784_p0 = scmp.lt.u32.totalorder %s776_s23, %s1104_s10 }
 0x1de   : > { %p778_p10 = pnand %p777_p11, %p1186_p2 }
 0x1df   : > { %p783_p13 = por %p782_p8, %p781_p1 }
 0x1e0   : > { %p779_p12 = pneg %p778_p10 }
 0x1e1   : > { %p785_p4 = por %p784_p0, %p783_p13 }
 0x1e3   : > { %p786_p6 = pnand %p785_p4, %p779_p12 }
 0x1e5   : > { %789 = shalt.err (!%p786_p6)
}
 0x1e6   : > { %s888_s15 = smov 128   ;;  %s889_s25 = smov 256  }
 0x1e7   : > { %s890_s29 = smov 8  }
 0x1e8   : > { %623 = dma.vmem_to_hbm [thread:$0]  (%p1186_p2), %s1099_s27, 256, %s1104_s10, %s439_s22, %s888_s15, %s889_s25, %s890_s29  }
 0x1e9 PF: > { %s1187_s8 = sld [smem:[#allocation9_spill]]  ;;  %p634_p7 = scmp.ge.s32.totalorder %s876_s21, 2 }
 0x1ea   : > { %p1188_p9 = scmp.ne.s32.totalorder %s1182_s5, 0 }
 0x1ec   : > { %p630_p3 = pnand %p634_p7, %p1188_p9 }
 0x1ef   : > { %s469_s7 = sand.u32 1, %s1187_s8  }
 0x1f0   : > { %s470_s30 = scalar_lea.sflag [#allocation5], %s469_s7 }
 0x1f1   : > { %835 = dma.done.wait (!%p630_p3), %s470_s30, 256  }
 0x1f2   : > { %837 = vsyncadd (!%p630_p3), %s470_s30, 4294967040  ;;  %s19_s21 = sadd.s32 1, %s876_s21   ;;  %s1189_s15 = sld [smem:[#allocation10_spill]] }
 0x1f3   : > { %p16_p5 = scmp.ge.s32.totalorder %s19_s21, 14   ;;  %s1190_s18 = sld [smem:[#allocation11_spill]] }
 0x1f4   : > { %s1191_s4 = sld [smem:[#allocation12_spill]]  ;;  %s1192_s12 = smov %s844_s13 }
 0x1f5   : > { %s1193_s13 = smov %s848_s14  ;;  %s1194_s14 = smov %s1016_s11 }
 0x1f6   : > { %s1195_s16 = smov %s868_s19  ;;  %s1196_s17 = smov %s872_s20 }
 0x1f7   : > { %s1198_s20 = smov %s1208_s26  ;;  %18 = sbr.rel (!%p16_p5) target bundleno = 11 (0xb), region = 91 }
 0x1fa   : > { %s1197_s19 = smov %s1191_s4 }
 0x1fe   :  { %475 = vsyncpa [#allocation4], 1 }
 0x1ff   :  { %477 = vsyncpa [#allocation4 + $0x1], 1 }
 0x200   :  { %478 = vsyncpa [#allocation5], 1 }
 0x201   :  { %480 = vsyncpa [#allocation5 + $0x1], 1 }

</bundles_post_ra>
